<compile_context>
chip_gen: v5e
topology: v5e:2x2
jax: 0.10.0
libtpu: 0.0.40
codegen_flags: <defaults>
</compile_context>

<pallas_src>
import functools

import jax
import jax.numpy as jnp
from jax.experimental import pallas as pl
from jax.experimental.pallas import tpu as pltpu


def _round_up(x: int, m: int) -> int:
    return (x + m - 1) // m * m


def _elman_seq_kernel(xproj_ref, wh_ref, state0_ref, out_ref, state_sc):
    """One grid step = one (batch_block, timestep) pair.

    xproj_ref : (1, B_blk, H_pad)  f32   precomputed inp @ W_x + b_h for step t
    wh_ref    : (H_pad, H_pad)     bf16  recurrent weight, VMEM-resident
    state0_ref: (B_blk, H_pad)     f32   initial state (read only at t == 0)
    out_ref   : (1, B_blk, H_pad)        new state for step t
    state_sc  : (B_blk, H_pad)     f32   recurrent carry (VMEM scratch)
    """
    t = pl.program_id(1)

    @pl.when(t == 0)
    def _():
        state_sc[...] = state0_ref[...].astype(jnp.float32)

    # state @ W_h on the MXU: bf16 operands, f32 accumulation.
    pre = jnp.dot(state_sc[...].astype(wh_ref.dtype), wh_ref[...],
                  preferred_element_type=jnp.float32)
    pre = pre + xproj_ref[0]                      # bias already folded in

    # sigmoid(x) = 0.5 * tanh(0.5 * x) + 0.5  -> single EUP op, rest on VALU.
    new_state = 0.5 * jnp.tanh(0.5 * pre) + 0.5

    state_sc[...] = new_state                     # f32 carry for next step
    out_ref[0] = new_state.astype(out_ref.dtype)


def elman_rnn(inputs, state0, w_x, w_h, b_h, *, compute_dtype=jnp.bfloat16):
    """Roll the ElmanCell over T timesteps.

    inputs: [T, B, input_dim]
    state0: [B, hidden_dim]
    w_x:    [input_dim, hidden_dim]   (transposed nn.Linear weight, bias=False)
    w_h:    [hidden_dim, hidden_dim]  (transposed nn.Linear weight)
    b_h:    [1, hidden_dim]
    returns all states [T, B, hidden_dim] in state0.dtype
    """
    T, B, I = inputs.shape
    Bs, H = state0.shape
    assert B == Bs

    SUB, LANE = 8, 128
    B_pad = _round_up(B, SUB)
    H_pad = _round_up(H, LANE)

    # ---- input projection hoisted out of the recurrence (one big GEMM) -----
    x_proj = jnp.einsum(
        "tbi,ih->tbh",
        inputs.astype(jnp.float32), w_x.astype(jnp.float32),
        preferred_element_type=jnp.float32,
    ) + b_h.astype(jnp.float32)

    # ---- one-time padding (per pallas_call, not per timestep) --------------
    x_proj_p = jnp.zeros((T, B_pad, H_pad), jnp.float32)
    x_proj_p = x_proj_p.at[:, :B, :H].set(x_proj)

    wh_p = jnp.zeros((H_pad, H_pad), compute_dtype)
    wh_p = wh_p.at[:H, :H].set(w_h.astype(compute_dtype))

    s0_p = jnp.zeros((B_pad, H_pad), jnp.float32)
    s0_p = s0_p.at[:B, :H].set(state0.astype(jnp.float32))

    # ---- batch blocking: >=2 parallel programs when B allows (v7x 2 TCs) ---
    if B_pad >= 16 and B_pad % 16 == 0:
        B_blk = B_pad // 2
    else:
        B_blk = B_pad
    nb = B_pad // B_blk

    states_p = pl.pallas_call(
        _elman_seq_kernel,
        out_shape=jax.ShapeDtypeStruct((T, B_pad, H_pad), state0.dtype),
        grid=(nb, T),
        in_specs=[
            # per-step input projection, streamed
            pl.BlockSpec((1, B_blk, H_pad), lambda b, t: (t, b, 0)),
            # recurrent weight, block index constant over t -> VMEM resident
            pl.BlockSpec((H_pad, H_pad), lambda b, t: (0, 0)),
            # initial state, only re-DMA'd when the batch block changes
            pl.BlockSpec((B_blk, H_pad), lambda b, t: (b, 0)),
        ],
        out_specs=pl.BlockSpec((1, B_blk, H_pad), lambda b, t: (t, b, 0)),
        scratch_shapes=[pltpu.VMEM((B_blk, H_pad), jnp.float32)],
        compiler_params=pltpu.CompilerParams(
            dimension_semantics=("parallel", "arbitrary")),
    )(x_proj_p, wh_p, s0_p)

    return states_p[:, :B, :H]


def elman_cell(inp, state, w_x, w_h, b_h, *, compute_dtype=jnp.bfloat16):
    """Single-step ElmanCell forward, matching the PyTorch module."""
    return elman_rnn(inp[None], state, w_x, w_h, b_h,
                     compute_dtype=compute_dtype)[0]


def elman_cell_ref(inp, state, w_x, w_h, b_h):
    # Pure-JAX f32 reference matching the PyTorch module (default config).
    return jax.nn.sigmoid(state @ w_h + b_h + inp @ w_x)


if __name__ == "__main__":
    B, input_dim, hidden_dim, T = 8, 16, 32, 6

    key = jax.random.PRNGKey(0)
    k_inp, k_state, k_wx, k_wh, k_bh = jax.random.split(key, 5)

    inputs = jax.random.normal(k_inp, (T, B, input_dim), dtype=jnp.float32)
    state0 = jax.random.normal(k_state, (B, hidden_dim), dtype=jnp.float32)
    # nn.Linear-style parameters, stored pre-transposed.
    w_x = jax.random.normal(k_wx, (input_dim, hidden_dim), jnp.float32) * 0.1
    w_h = jax.random.normal(k_wh, (hidden_dim, hidden_dim), jnp.float32) * 0.1
    b_h = jax.random.normal(k_bh, (1, hidden_dim), jnp.float32) * 0.1

    # ---- T-step rollout through the single pallas_call ---------------------
    run_seq = jax.jit(functools.partial(elman_rnn, compute_dtype=jnp.bfloat16))
    states = jax.block_until_ready(run_seq(inputs, state0, w_x, w_h, b_h))

    def ref_step(s, x):
        s = elman_cell_ref(x, s, w_x, w_h, b_h)
        return s, s

    _, ref_states = jax.lax.scan(ref_step, state0, inputs)

    assert states.shape == (T, B, hidden_dim)
    assert jnp.allclose(states, ref_states, atol=2e-2, rtol=2e-2), (
        float(jnp.max(jnp.abs(states - ref_states))))

    # ---- single-step call == PyTorch module forward -------------------------
    run_cell = jax.jit(functools.partial(elman_cell, compute_dtype=jnp.bfloat16))
    out1 = jax.block_until_ready(run_cell(inputs[0], state0, w_x, w_h, b_h))
    ref1 = elman_cell_ref(inputs[0], state0, w_x, w_h, b_h)
    assert out1.shape == (B, hidden_dim)
    assert jnp.allclose(out1, ref1, atol=2e-2, rtol=2e-2), (
        float(jnp.max(jnp.abs(out1 - ref1))))

    print("KERNEL_OK")
</pallas_src>

<mosaic_0001>
module attributes {stable_mosaic.version = 11 : i64} {
  func.func @_elman_seq_kernel(%arg0: i32, %arg1: i32, %arg2: memref<1x8x128xf32, #tpu.memory_space<vmem>>, %arg3: memref<128x128xbf16, #tpu.memory_space<vmem>>, %arg4: memref<8x128xf32, #tpu.memory_space<vmem>>, %arg5: memref<1x8x128xf32, #tpu.memory_space<vmem>>, %arg6: memref<8x128xf32, #tpu.memory_space<vmem>>) attributes {dimension_semantics = [#tpu.dimension_semantics<parallel>, #tpu.dimension_semantics<arbitrary>], iteration_bounds = array<i64: 1, 6>, scalar_prefetch = 0 : i64, scratch_operands = 1 : i64, tpu.core_type = #tpu.core_type<tc>, window_params = [{transform_indices = @transform_0, window_bounds = array<i64: 1, 8, 128>}, {pipeline_mode = #tpu.pipeline_mode<synchronous>, transform_indices = @transform_1, window_bounds = array<i64: 128, 128>}, {transform_indices = @transform_2, window_bounds = array<i64: 8, 128>}, {transform_indices = @transform_3, window_bounds = array<i64: 1, 8, 128>}]} {
    %c0_i32 = arith.constant 0 : i32
    %0 = arith.cmpi eq, %arg1, %c0_i32 : i32
    %1 = arith.extui %0 : i1 to i32
    %c0_i32_0 = arith.constant 0 : i32
    %2 = arith.cmpi ne, %1, %c0_i32_0 : i32
    scf.if %2 {
      %c0_15 = arith.constant 0 : index
      %c0_16 = arith.constant 0 : index
      %21 = vector.load %arg4[%c0_15, %c0_16] : memref<8x128xf32, #tpu.memory_space<vmem>>, vector<8x128xf32>
      %c0_17 = arith.constant 0 : index
      %c0_18 = arith.constant 0 : index
      %22 = vector.load %arg6[%c0_17, %c0_18] : memref<8x128xf32, #tpu.memory_space<vmem>>, vector<8x128xf32>
      tpu.vector_store %arg6[%c0_17, %c0_18], %21 {strides = array<i32>} : memref<8x128xf32, #tpu.memory_space<vmem>>, vector<8x128xf32>,
    } else {
    }
    %c0 = arith.constant 0 : index
    %c0_1 = arith.constant 0 : index
    %3 = vector.load %arg6[%c0, %c0_1] : memref<8x128xf32, #tpu.memory_space<vmem>>, vector<8x128xf32>
    %4 = arith.truncf %3 : vector<8x128xf32> to vector<8x128xbf16>
    %c0_2 = arith.constant 0 : index
    %c0_3 = arith.constant 0 : index
    %5 = vector.load %arg3[%c0_2, %c0_3] : memref<128x128xbf16, #tpu.memory_space<vmem>>, vector<128x128xbf16>
    %cst = arith.constant dense<0.000000e+00> : vector<8x128xf32>
    %6 = tpu.matmul %4, %5, %cst {dimension_numbers = #tpu.dot_dimension_numbers<[1], [0], [0], [1], [0, 0, 1, 1], [], []>} : vector<8x128xbf16>, vector<128x128xbf16>, vector<8x128xf32> -> vector<8x128xf32>
    %c0_4 = arith.constant 0 : index
    %c0_5 = arith.constant 0 : index
    %c0_6 = arith.constant 0 : index
    %7 = vector.load %arg2[%c0_4, %c0_5, %c0_6] : memref<1x8x128xf32, #tpu.memory_space<vmem>>, vector<1x8x128xf32>
    %8 = vector.shape_cast %7 : vector<1x8x128xf32> to vector<8x128xf32>
    %9 = arith.addf %6, %8 : vector<8x128xf32>
    %cst_7 = arith.constant 5.000000e-01 : f32
    %10 = vector.broadcast %cst_7 : f32 to vector<8x128xf32>
    %11 = arith.mulf %10, %9 : vector<8x128xf32>
    %12 = math.tanh %11 : vector<8x128xf32>
    %cst_8 = arith.constant 5.000000e-01 : f32
    %13 = vector.broadcast %cst_8 : f32 to vector<8x128xf32>
    %14 = arith.mulf %13, %12 : vector<8x128xf32>
    %cst_9 = arith.constant 5.000000e-01 : f32
    %15 = vector.broadcast %cst_9 : f32 to vector<8x128xf32>
    %16 = arith.addf %14, %15 : vector<8x128xf32>
    %c0_10 = arith.constant 0 : index
    %c0_11 = arith.constant 0 : index
    %17 = vector.load %arg6[%c0_10, %c0_11] : memref<8x128xf32, #tpu.memory_space<vmem>>, vector<8x128xf32>
    tpu.vector_store %arg6[%c0_10, %c0_11], %16 {strides = array<i32>} : memref<8x128xf32, #tpu.memory_space<vmem>>, vector<8x128xf32>,
    %c0_12 = arith.constant 0 : index
    %c0_13 = arith.constant 0 : index
    %c0_14 = arith.constant 0 : index
    %18 = vector.load %arg5[%c0_12, %c0_13, %c0_14] : memref<1x8x128xf32, #tpu.memory_space<vmem>>, vector<1x8x128xf32>
    %19 = vector.shape_cast %18 : vector<1x8x128xf32> to vector<8x128xf32>
    %20 = vector.shape_cast %16 : vector<8x128xf32> to vector<1x8x128xf32>
    tpu.vector_store %arg5[%c0_12, %c0_13, %c0_14], %20 {strides = array<i32>} : memref<1x8x128xf32, #tpu.memory_space<vmem>>, vector<1x8x128xf32>,
    return
  }
  func.func @transform_0(%arg0: i32, %arg1: i32) -> (i32, i32, i32) {
    %c0_i32 = arith.constant 0 : i32
    %c0_i32_0 = arith.constant 0 : i32
    return %arg1, %arg0, %c0_i32 : i32, i32, i32
  }
  func.func @transform_1(%arg0: i32, %arg1: i32) -> (i32, i32) {
    %c0_i32 = arith.constant 0 : i32
    %c0_i32_0 = arith.constant 0 : i32
    %c0_i32_1 = arith.constant 0 : i32
    return %c0_i32, %c0_i32_0 : i32, i32
  }
  func.func @transform_2(%arg0: i32, %arg1: i32) -> (i32, i32) {
    %c0_i32 = arith.constant 0 : i32
    %c0_i32_0 = arith.constant 0 : i32
    return %arg0, %c0_i32 : i32, i32
  }
  func.func @transform_3(%arg0: i32, %arg1: i32) -> (i32, i32, i32) {
    %c0_i32 = arith.constant 0 : i32
    %c0_i32_0 = arith.constant 0 : i32
    return %arg1, %arg0, %c0_i32 : i32, i32, i32
  }
}

</mosaic_0001>

<bundles_post_ra>
// kernel: elman_rnn.1
= control target key start
LH: loop header
LB: loop body
LE: loop exit
PB: predicated region body
PF: predicated region fallthrough
CT: control target
= control target key end

     0   :  { %8 = vsyncpa [#allocation4], 0  ;;  %s749_s0 = inlined_call_operand.vmem [shape: f32[6,8,128], index: 0, kind: input, shape index: {}]   ;;  %s750_s1 = inlined_call_operand.vmem [shape: bf16[128,128], index: 1, kind: input, shape index: {}]   ;;  %s751_s2 = inlined_call_operand.vmem [shape: f32[8,128], index: 2, kind: input, shape index: {}]   ;;  %s752_s3 = inlined_call_operand.hbm [shape: f32[6,8,128], index: 3, kind: output, shape index: {}]  }
   0x1   :  { %10 = vsyncpa [#allocation4 + $0x1], 0  ;;  %s613_s12 = smov 0   ;;  %s615_s13 = smov 0  }
   0x2   :  { %s617_s14 = smov 0   ;;  %s619_s15 = smov 0  }
   0x3   :  { %s621_s16 = smov 0   ;;  %s623_s17 = smov 0  }
   0x4 LB: > { %s403_s18 = sadd.s32 4294967295, %s591_s17   ;;  %s404_s19 = sadd.s32 4294967294, %s591_s17   ;;  %s591_s17 = sphi %s623_s17, %s16_s17   ;;  %s587_s16 = sphi %s621_s16, %s759_s16   ;;  %s583_s15 = sphi %s619_s15, %s758_s15   ;;  %s579_s14 = sphi %s617_s14, %s757_s14   ;;  %s575_s13 = sphi %s615_s13, %s756_s13   ;;  %s571_s12 = sphi %s613_s12, %s755_s12  }
   0x5   : > { %s25_s20 = sadd.s32 1, %s587_s16  ;;  %s112_s21 = sadd.s32 1, %s579_s14 }
   0x6   : > { %p26_p0 = scmp.ge.s32.totalorder %s25_s20, 6  ;;  %p122_p1 = scmp.ne.s32.totalorder %s579_s14, %s575_s13 }
   0x7   : > { %p123_p2 = scmp.eq.s32.totalorder %s403_s18, 5  ;;  %p128_p3 = scmp.ne.s32.totalorder %s575_s13, %s571_s12 }
   0x8   : > { %s761_s20 = smov (%p26_p0, %s25_s20), 0  ;;  %p129_p5 = scmp.eq.s32.totalorder %s404_s19, 5 }
   0x9   : > { %p653_p4 = por %p123_p2, %p122_p1  ;;  %s107_s23 = ssub.s32 %s587_s16, %s761_s20 }
   0xa   : > { %p408_p6 = scmp.ge.s32.totalorder %s591_s17, 1  ;;  %p110_p7 = scmp.eq.s32.totalorder %s107_s23, 0 }
   0xb   : > { %p660_p8 = por %p129_p5, %p128_p3  ;;  %p167_p9 = scmp.lt.s32.totalorder %s591_s17, 7 }
   0xc   : > { %s666_s25 = scalar_select %p110_p7, %s579_s14, %s112_s21  }
   0xd   : > { %p168_p10 = pnand %p408_p6, %p167_p9 }
   0xe   : > { %s194_s26 = sand.u32 (!%p168_p10), 1, %s575_s13   ;;  %p197_p11 = scmp.lt.s32.totalorder (!%p168_p10), %s583_s15, 5 }
   0xf   : > { %171 = sbr.rel (%p168_p10) target bundleno = 205 (0xcd), region = 32  ;;  %s672_s27 = sshll.u32 (!%p168_p10), %s194_s26, 3 }
  0x10   : > { %s196_s6 = scalar_lea.vmem (!%p168_p10), [#allocation3], %s672_s27  ;;  %p411_p12 = scmp.ne.s32.totalorder (!%p168_p10), %s583_s15, 0 }
  0x14   : > { %s198_s28 = scalar_select %p197_p11, %s583_s15, 5 }
  0x15   : > { %211 = sbr.rel (%p411_p12) target bundleno = 28 (0x1c), region = 36 }
  0x16   : > { %s410_s29 = sshll.u32 %s198_s28, 3 }
  0x17   : > { %s203_s5 = scalar_lea.vmem %s749_s0, %s410_s29 }
  0x1a   : > { %v212_v0 = vld [vmem:[%s751_s2] sm:$0xff] }
  0x1b   : > { %213 = vst [vmem:[#allocation2] sm:$0xff] %v212_v0 }
  0x1c PF: > { %v455_v1 = vld [vmem:[%s750_s1 + $0x38] sm:$0xff]  ;;  %v454_v2 = vld [vmem:[%s750_s1 + $0x30] sm:$0xff]  ;;  %v453_v3 = vld [vmem:[%s750_s1 + $0x28] sm:$0xff]  ;;  %s445_s18 = sshll.u32 %s583_s15, 3  ;;  %s314_s28 = sshll.u32 %s196_s6, 4  ;;  %s315_s28 = int_to_ptr.vmem [resolvable:$true] %s314_s28 }
  0x1d   : > { %281 = vmatpush.bf16.msra.mxu0 %v455_v1  ;;  %v452_v4 = vld [vmem:[%s750_s1 + $0x20] sm:$0xff]  ;;  %v451_v5 = vld [vmem:[%s750_s1 + $0x18] sm:$0xff]  ;;  %v450_v6 = vld [vmem:[%s750_s1 + $0x10] sm:$0xff]  ;;  %s312_s23 = scalar_lea.hbm %s752_s3, %s445_s18  ;;  %s533_s8 = scalar_lea.hbm %s752_s3, 48 }
  0x1e   : > { %v449_v7 = vld [vmem:[%s750_s1 + $0x8] sm:$0xff]  ;;  %v448_v8 = vld [vmem:[%s750_s1] sm:$0xff]  ;;  %s316_s29 = sshll.u32 %s312_s23, 4  ;;  %s317_s29 = int_to_ptr.hbm [resolvable:$true] %s316_s29 }
  0x1f   : > { %v232_v11 = vld [vmem:[%s203_s5] sm:$0xff]  ;;  %s301_s5 = scalar_lea.sflag [#allocation4], %s194_s26  ;;  %s527_s15 = sshra.s32 %s317_s29, 4  ;;  %s528_s15 = int_to_ptr.hbm [resolvable:$true] %s527_s15 }
  0x20   : > { %s529_s30 = scalar_lea.hbm %s528_s15, 8  ;;  %p534_p2 = scmp.lt.s32.totalorder %s528_s15, %s752_s3 }
  0x21   : > { %282 = vmatpush.bf16.msra.mxu0 %v454_v2  ;;  %p530_p13 = scmp.ne.s32.totalorder %s528_s15, %s529_s30  ;;  %p535_p3 = scmp.lt.s32.totalorder %s533_s8, %s529_s30 }
  0x22   : > { %v214_v9 = vld [vmem:[#allocation2] sm:$0xff] }
  0x23   : > { %v215_v10 = vpack.c.bf16 %v214_v9, %v214_v9  ;;  %p531_p0 = pnand %p530_p13, %p653_p4  ;;  %p536_p5 = por %p535_p3, %p534_p2 }
  0x25   : > { %283 = vmatpush.bf16.msra.mxu0 %v453_v3  ;;  %p532_p1 = pneg %p531_p0 }
  0x27   : > { %p537_p6 = pnand %p536_p5, %p532_p1 }
  0x29   : > { %284 = vmatpush.bf16.msra.mxu0 %v452_v4 }
  0x2d   : > { %285 = vmatpush.bf16.msra.mxu0 %v451_v5 }
  0x31   : > { %286 = vmatpush.bf16.msra.mxu0 %v450_v6 }
  0x35   : > { %287 = vmatpush.bf16.msra.mxu0 %v449_v7 }
  0x39   : > { %288 = vmatpush.bf16.msra.mxu0 %v448_v8 }
  0x3c   : > { %289 = vmatmul.bf16.vlgmr.msra.gmra.mxu0 %v215_v10 }
  0xb9   : > { %v290_v12 = vpop.f32.mrf.mxu0 }
  0xba   : > { %v291_v13 = vadd.f32 %v290_v12, %v232_v11 }
  0xbc   : > { %v294_v14 = vmul.f32 0.5, %v291_v13 }
  0xbe   : > { %511 = vtanh.f32 %v294_v14 }
  0xc1   : > { %v292_v15 = vpop.f32.mrf.mxu0 }
  0xc4   : > { %v512_v16 = vpop.eup %511 }
  0xc5   : > { %v296_v17 = vmul.f32 0.5, %v512_v16 }
  0xc7   : > { %v297_v18 = vadd.f32 0.5, %v296_v17 }
  0xc9   : > { %298 = vst [vmem:[#allocation2] sm:$0xff] %v297_v18 }
  0xca   : > { %299 = vst [vmem:[%s196_s6] sm:$0xff] %v297_v18 }
  0xcb   : > { %540 = shalt.err (!%p537_p6)
}
  0xcc   : > { %456 = dma.vmem_to_hbm [thread:$0]  (%p653_p4), %s315_s28, 128, %s317_s29, %s301_s5  }
  0xcd PF: > { %p462_p7 = scmp.ge.s32.totalorder %s591_s17, 2  ;;  %s328_s26 = sand.u32 1, %s571_s12  }
  0xce   : > { %s329_s27 = scalar_lea.sflag [#allocation4], %s328_s26 }
  0xcf   : > { %p459_p9 = pnand %p462_p7, %p660_p8 }
  0xd1   : > { %p460_p10 = pneg %p459_p9 }
  0xd3   : > { %566 = dma.done.wait (%p460_p10), %s329_s27, 128  }
  0xd4   : > { %568 = vsyncadd (%p460_p10), %s329_s27, 4294967168  ;;  %s16_s17 = sadd.s32 1, %s591_s17   ;;  %s755_s12 = smov %s575_s13 }
  0xd5   : > { %p13_p11 = scmp.ge.s32.totalorder %s16_s17, 8   ;;  %s756_s13 = smov %s579_s14 }
  0xd6   : > { %s757_s14 = smov %s666_s25  ;;  %s758_s15 = smov %s587_s16 }
  0xd7   : > { %s759_s16 = smov %s761_s20  ;;  %15 = sbr.rel (!%p13_p11) target bundleno = 4 (0x4), region = 74 }
  0xdc   :  { %335 = vsyncpa [#allocation4], 1 }
  0xdd   :  { %337 = vsyncpa [#allocation4 + $0x1], 1 }

</bundles_post_ra>
